<compile_context>
chip_gen: v5e
topology: v5e:2x2
jax: 0.10.0
libtpu: 0.0.40
codegen_flags: <defaults>
</compile_context>

<pallas_src>
import functools

import jax
import jax.numpy as jnp
from jax.experimental import pallas as pl
from jax.experimental.pallas import tpu as pltpu

MEAN = 0.0   # module defaults from GaussianNoise.__init__
STD = 0.1

LANES = 128              # vreg lane width; last dim of the 2D slab
SMALL_TENSOR_BYTES = 1 << 20   # below this, fused XLA beats the pallas_call overhead


def _tpu_generation():
    """Best-effort TPU generation (7, 6, 5) or 0 for unknown / non-TPU."""
    try:
        devices = jax.devices()
    except Exception:
        return 0
    if not devices or devices[0].platform != "tpu":
        return 0
    kind = devices[0].device_kind.lower()
    for gen in (7, 6, 5):
        if f"v{gen}" in kind:
            return gen
    return 0


def _tile_config(gen):
    """(max_block_rows, vmem_limit_bytes) per generation.

    Live VMEM ~= 5 * block_bytes (in+out double-buffered + noise temp):
      v7x : 6 MiB block -> ~30 MiB live, needs the 48 MiB limit (64 MiB phys).
      v6e : 4 MiB block -> ~20 MiB live, fits the 32 MiB scoped default.
      v5e : 2 MiB block -> ~10 MiB live, fits the 16 MiB scoped default.
    """
    if gen >= 7:
        return 12288, 48 << 20
    if gen == 6:
        return 8192, None
    return 4096, None


def _row_tiling(rows, gen):
    """Pick (block_rows, n_blocks) for the (rows, 128) slab."""
    max_block_rows, vmem_limit = _tile_config(gen)

    # On v7x keep >= 2 (and even) blocks for mid-size slabs so the "parallel"
    # row axis splits across both TensorCores; on 1-TC chips it's irrelevant.
    min_blocks = 2 if (gen >= 7 and rows >= 1024) else 1
    n_blocks = max(pl.cdiv(rows, max_block_rows), min_blocks)
    if gen >= 7 and n_blocks > 1 and n_blocks % 2:
        n_blocks += 1

    if n_blocks == 1:
        block_rows = rows            # full extent, no (8,128) divisibility needed
    else:
        block_rows = pl.cdiv(rows, n_blocks)
        block_rows = ((block_rows + 7) // 8) * 8     # sublane-aligned
        n_blocks = pl.cdiv(rows, block_rows)          # last block may be partial (masked)
    return block_rows, n_blocks, vmem_limit


def _noise_kernel_tpu(seed_ref, x_ref, o_ref, *, mean, std):
    # seed_ref: SMEM scalar (scalar prefetch); x_ref/o_ref: (block_rows, 128) VMEM.
    # Multiplicative mix of (host seed, tile id): decorrelates adjacent tiles and
    # avoids the (seed, tile+1) vs (seed+1, tile) collision of plain addition.
    mixed = (seed_ref[0] * jnp.int32(1812433253)
             + pl.program_id(0) * jnp.int32(16777619)
             + jnp.int32(1013904223))
    pltpu.prng_seed(mixed)
    # TODO(synk): on v6e/v7x a bf16 Box-Muller (or a VPU-only sum-of-uniforms
    # sampler) would offload the single EUP slot; kept f32 here so the sampler
    # lowers on every generation (no bf16 EUP on v5e) and stays a true Gaussian.
    noise = pltpu.stateful_normal(x_ref.shape, jnp.float32)
    if mean == 0.0:
        o_ref[...] = (x_ref[...] + std * noise).astype(o_ref.dtype)
    else:
        o_ref[...] = (x_ref[...] + (std * noise + mean)).astype(o_ref.dtype)


def _add_noise_kernel(x_ref, n_ref, o_ref, *, mean, std):
    # Fallback path: standard-normal noise sampled outside, scale+add in-kernel.
    if mean == 0.0:
        o_ref[...] = (x_ref[...] + std * n_ref[...]).astype(o_ref.dtype)
    else:
        o_ref[...] = (x_ref[...] + (std * n_ref[...] + mean)).astype(o_ref.dtype)


def _xla_gaussian_noise(x, seed, mean, std):
    noise = jax.random.normal(jax.random.PRNGKey(int(seed)), x.shape, jnp.float32)
    return (x.astype(jnp.float32) + (std * noise + mean)).astype(x.dtype)


def gaussian_noise(x, seed, mean=MEAN, std=STD, *, force_pallas=False):
    """x: any-shape float array (NCHW in the test). seed: python int.

    force_pallas: run the Pallas kernel even for tiny tensors (used by the
    self-test; in production the <1 MiB fused-XLA fast path is preferable).
    """
    orig_shape = x.shape
    orig_dtype = x.dtype
    total = x.size
    mean = float(mean)
    std = float(std)

    if total == 0:
        return x

    # Tiny tensors: the fixed pallas_call setup dominates -> fused XLA instead.
    if not force_pallas and total * x.dtype.itemsize < SMALL_TENSOR_BYTES:
        return _xla_gaussian_noise(x, seed, mean, std)

    rows = total // LANES
    tail = total - rows * LANES
    if rows == 0:
        # Less than one lane row; not worth a kernel.
        return _xla_gaussian_noise(x, seed, mean, std)

    x_flat = jnp.reshape(x, (-1,))
    if tail:
        # Rare ragged tail: handle the (< 128 elem) remainder with plain XLA
        # instead of padding + slicing the whole slab (saves 2 full HBM passes).
        x_main = x_flat[: rows * LANES]
        x_tail = x_flat[rows * LANES:]
    else:
        x_main = x_flat
        x_tail = None

    x2d = jnp.reshape(x_main, (rows, LANES))

    gen = _tpu_generation()
    block_rows, n_blocks, vmem_limit = _row_tiling(rows, gen)

    n_elems = rows * LANES
    cost = pl.CostEstimate(
        flops=2 * n_elems,                                  # scale + add
        transcendentals=2 * n_elems,                        # Box-Muller log/cos
        bytes_accessed=2 * n_elems * x.dtype.itemsize,      # read x + write out
    )

    if jax.default_backend() == "tpu":
        kernel = functools.partial(_noise_kernel_tpu, mean=mean, std=std)
        seed_arr = jnp.asarray([seed], dtype=jnp.int32)
        cp_kwargs = dict(dimension_semantics=("parallel",))  # megacore on v7x
        if vmem_limit is not None:
            cp_kwargs["vmem_limit_bytes"] = vmem_limit
        out2d = pl.pallas_call(
            kernel,
            out_shape=jax.ShapeDtypeStruct((rows, LANES), orig_dtype),
            grid_spec=pltpu.PrefetchScalarGridSpec(
                num_scalar_prefetch=1,
                grid=(n_blocks,),
                in_specs=[pl.BlockSpec((block_rows, LANES), lambda i, seed: (i, 0))],
                out_specs=pl.BlockSpec((block_rows, LANES), lambda i, seed: (i, 0)),
            ),
            compiler_params=pltpu.CompilerParams(**cp_kwargs),
            cost_estimate=cost,
        )(seed_arr, x2d)
    else:
        # Non-TPU backend: HW PRNG primitives have no lowering; sample outside.
        noise2d = jax.random.normal(
            jax.random.PRNGKey(int(seed)), (rows, LANES), dtype=jnp.float32)
        kernel = functools.partial(_add_noise_kernel, mean=mean, std=std)
        out2d = pl.pallas_call(
            kernel,
            out_shape=jax.ShapeDtypeStruct((rows, LANES), orig_dtype),
            grid=(n_blocks,),
            in_specs=[
                pl.BlockSpec((block_rows, LANES), lambda i: (i, 0)),
                pl.BlockSpec((block_rows, LANES), lambda i: (i, 0)),
            ],
            out_specs=pl.BlockSpec((block_rows, LANES), lambda i: (i, 0)),
        )(x2d, noise2d)

    out_flat = jnp.reshape(out2d, (-1,))
    if tail:
        tail_noise = jax.random.normal(
            jax.random.PRNGKey(int(seed) ^ 0x5DEECE66), (tail,), dtype=jnp.float32)
        out_tail = (x_tail.astype(jnp.float32)
                    + (std * tail_noise + mean)).astype(orig_dtype)
        out_flat = jnp.concatenate([out_flat, out_tail])
    return jnp.reshape(out_flat, orig_shape)


if __name__ == "__main__":
    key = jax.random.PRNGKey(0)
    # NCHW input, consistent with the original conv-net usage.
    x = jax.random.normal(key, (2, 4, 16, 16), dtype=jnp.float32)

    # force_pallas=True so the small self-test shape exercises the kernel
    # (in production, tensors below ~1 MiB take the fused-XLA fast path).
    y = gaussian_noise(x, seed=0, force_pallas=True)
    y = jax.block_until_ready(y)

    assert y.shape == x.shape and y.dtype == x.dtype

    # Sanity: the added noise should have roughly the requested mean/std.
    noise = y - x
    m = float(jnp.mean(noise))
    s = float(jnp.std(noise))
    assert abs(m - MEAN) < 0.05, f"noise mean off: {m}"
    assert abs(s - STD) < 0.05, f"noise std off: {s}"

    print("KERNEL_OK")
</pallas_src>

<mosaic_0001>
module attributes {stable_mosaic.version = 11 : i64} {
  func.func @_add_noise_kernel(%arg0: i32, %arg1: memref<16x128xf32, #tpu.memory_space<vmem>>, %arg2: memref<16x128xf32, #tpu.memory_space<vmem>>, %arg3: memref<16x128xf32, #tpu.memory_space<vmem>>) attributes {dimension_semantics = [#tpu.dimension_semantics<arbitrary>], iteration_bounds = array<i64: 1>, scalar_prefetch = 0 : i64, scratch_operands = 0 : i64, tpu.core_type = #tpu.core_type<tc>, window_params = [{transform_indices = @transform_0, window_bounds = array<i64: 16, 128>}, {transform_indices = @transform_1, window_bounds = array<i64: 16, 128>}, {transform_indices = @transform_2, window_bounds = array<i64: 16, 128>}]} {
    %c0 = arith.constant 0 : index
    %c0_0 = arith.constant 0 : index
    %0 = vector.load %arg1[%c0, %c0_0] : memref<16x128xf32, #tpu.memory_space<vmem>>, vector<16x128xf32>
    %c0_1 = arith.constant 0 : index
    %c0_2 = arith.constant 0 : index
    %1 = vector.load %arg2[%c0_1, %c0_2] : memref<16x128xf32, #tpu.memory_space<vmem>>, vector<16x128xf32>
    %cst = arith.constant 1.000000e-01 : f32
    %2 = vector.broadcast %cst : f32 to vector<16x128xf32>
    %3 = arith.mulf %2, %1 : vector<16x128xf32>
    %4 = arith.addf %0, %3 : vector<16x128xf32>
    %c0_3 = arith.constant 0 : index
    %c0_4 = arith.constant 0 : index
    %5 = vector.load %arg3[%c0_3, %c0_4] : memref<16x128xf32, #tpu.memory_space<vmem>>, vector<16x128xf32>
    tpu.vector_store %arg3[%c0_3, %c0_4], %4 {strides = array<i32>} : memref<16x128xf32, #tpu.memory_space<vmem>>, vector<16x128xf32>,
    return
  }
  func.func @transform_0(%arg0: i32) -> (i32, i32) {
    %c0_i32 = arith.constant 0 : i32
    %c0_i32_0 = arith.constant 0 : i32
    return %arg0, %c0_i32 : i32, i32
  }
  func.func @transform_1(%arg0: i32) -> (i32, i32) {
    %c0_i32 = arith.constant 0 : i32
    %c0_i32_0 = arith.constant 0 : i32
    return %arg0, %c0_i32 : i32, i32
  }
  func.func @transform_2(%arg0: i32) -> (i32, i32) {
    %c0_i32 = arith.constant 0 : i32
    %c0_i32_0 = arith.constant 0 : i32
    return %arg0, %c0_i32 : i32, i32
  }
}

</mosaic_0001>

<bundles_post_ra>
// kernel: tpu_custom_call.1
= control target key start
LH: loop header
LB: loop body
LE: loop exit
PB: predicated region body
PF: predicated region fallthrough
CT: control target
= control target key end

     0   :  { %7 = vsyncpa [#allocation3], 0  ;;  %s195_s0 = inlined_call_operand.hbm [shape: f32[16,128], index: 0, kind: input, shape index: {}]   ;;  %s196_s1 = inlined_call_operand.hbm [shape: f32[16,128], index: 1, kind: input, shape index: {}]   ;;  %s197_s2 = inlined_call_operand.hbm [shape: f32[16,128], index: 2, kind: output, shape index: {}]  }
   0x1   :  { %8 = vsyncpa [#allocation6], 0 }
   0x2   :  { %9 = vsyncpa [#allocation4], 0  ;;  %s14_s11 = sshll.u32 %s195_s0, 4  ;;  %s157_s12 = smov [#allocation2]   ;;  %s15_s11 = int_to_ptr.hbm [resolvable:$true] %s14_s11 }
   0x3   :  { %s16_s13 = sshll.u32 %s157_s12, 4  ;;  %s27_s16 = sshll.u32 %s196_s1, 4  ;;  %s17_s13 = int_to_ptr.vmem [resolvable:$true] %s16_s13  ;;  %s28_s16 = int_to_ptr.hbm [resolvable:$true] %s27_s16 }
   0x4   :  { %s158_s17 = smov 128   ;;  %s159_s18 = smov 8  }
   0x5   :  { %22 = dma.hbm_to_vmem [thread:$0]  %s15_s11, 256, %s17_s13, [#allocation3], %s158_s17, %s158_s17, %s159_s18  }
   0x6   :  { %s160_s19 = smov [#allocation5]  }
   0x7   :  { %s29_s20 = sshll.u32 %s160_s19, 4  ;;  %s30_s20 = int_to_ptr.vmem [resolvable:$true] %s29_s20 }
   0x8   :  { %35 = dma.hbm_to_vmem [thread:$0]  %s28_s16, 256, %s30_s20, [#allocation6], %s158_s17, %s158_s17, %s159_s18  }
   0x9   :  { %151 = dma.done.wait [#allocation3], 256  }
   0xa   :  { %152 = vsyncadd [#allocation3], 4294967040 }
   0xb   :  { %153 = dma.done.wait [#allocation6], 256  }
   0xc   :  { %154 = vsyncadd [#allocation6], 4294967040  ;;  %v44_v0 = vld [vmem:[#allocation2] sm:$0xff]  ;;  %v46_v1 = vld [vmem:[#allocation5] sm:$0xff]  ;;  %s161_s0 = smov [#allocation7]   ;;  %s60_s23 = sshll.u32 %s197_s2, 4  ;;  %s61_s23 = int_to_ptr.hbm [resolvable:$true] %s60_s23 }
   0xd   :  { %v48_v2 = vmul.f32 0.1, %v46_v1  ;;  %v45_v3 = vld [vmem:[#allocation2 + $0x8] sm:$0xff]  ;;  %v47_v4 = vld [vmem:[#allocation5 + $0x8] sm:$0xff]  ;;  %s58_s1 = sshll.u32 %s161_s0, 4  ;;  %s59_s1 = int_to_ptr.vmem [resolvable:$true] %s58_s1 }
   0xe   :  { %v49_v5 = vmul.f32 0.1, %v47_v4 }
   0xf   :  { %v50_v6 = vadd.f32 %v48_v2, %v44_v0 }
  0x10   :  { %v51_v7 = vadd.f32 %v49_v5, %v45_v3 }
  0x11   :  { %52 = vst [vmem:[#allocation7] sm:$0xff] %v50_v6 }
  0x12   :  { %53 = vst [vmem:[#allocation7 + $0x8] sm:$0xff] %v51_v7 }
  0x13   :  { %66 = dma.vmem_to_hbm [thread:$0]  %s59_s1, 256, %s61_s23, [#allocation4], %s158_s17, %s158_s17, %s159_s18  }
  0x14   :  { %155 = dma.done.wait [#allocation4], 256  }
  0x15   :  { %156 = vsyncadd [#allocation4], 4294967040 }
  0x16   :  { %71 = vsyncpa [#allocation3], 1 }
  0x17   :  { %72 = vsyncpa [#allocation6], 1 }
  0x18   :  { %73 = vsyncpa [#allocation4], 1 }

</bundles_post_ra>
